<compile_context>
chip_gen: v6e
topology: v6e:2x2x1
jax: 0.10.0
libtpu: 0.0.40
codegen_flags: <defaults>
</compile_context>

<pallas_src>
import jax
import jax.numpy as jnp
from jax import lax
from jax.experimental import pallas as pl
from jax.experimental.pallas import tpu as pltpu

_LANE = 128
_SUBLANE = 8


def _round_up(v, m):
    return ((v + m - 1) // m) * m


def _device_kind():
    try:
        return jax.devices()[0].device_kind.lower()
    except Exception:
        return ""


def _num_tensorcores():
    # 2 TensorCores per chip only on v7x; a 2-way split on single-TC v5e/v6e is a
    # pure-overhead serial loop, so gate it on the chip generation.
    return 2 if "v7" in _device_kind() else 1


def _default_compute_dtype():
    # bf16 MXU operands on v6e/v7x (f32 accumulation kept), f32 on v5e / unknown.
    kind = _device_kind()
    if "v6" in kind or "v7" in kind:
        return jnp.bfloat16
    return jnp.float32


def _global_sa_kernel(seg_ref, xp_ref, bid_ref, w1_ref, b1_ref, w2_ref, b2_ref,
                      out_ref):
    # seg_ref : (num_tiles, 2) int32 in SMEM -- [seg_lo, seg_hi] per point tile
    # xp_ref  : (TILE_N, CIN_pad)  packed [x | pos | 0-pad]   (compute dtype)
    # bid_ref : (TILE_N, 1) int32  example id per point; -1 for padding rows
    # w1_ref  : (CIN_pad, H1p)     b1_ref : (1, H1p) f32
    # w2_ref  : (H1p,  H2p)        b2_ref : (1, H2p) f32
    # out_ref : (B_pad, H2p) f32 -- constant block index along grid axis 1
    #                               => VMEM-resident running-max accumulator
    @pl.when(pl.program_id(1) == 0)
    def _init():
        out_ref[...] = jnp.full(out_ref.shape, -jnp.inf, dtype=out_ref.dtype)

    # Shared per-point MLP on the MXU (concat folded into the packed first layer).
    h = jnp.dot(xp_ref[...], w1_ref[...], preferred_element_type=jnp.float32)
    h = jnp.maximum(h + b1_ref[...], 0.0)                      # (TILE_N, H1p) f32
    h = jnp.dot(h.astype(w2_ref.dtype), w2_ref[...],
                preferred_element_type=jnp.float32) + b2_ref[...]
    h = jnp.maximum(h, 0.0)                                    # (TILE_N, H2p) f32

    # Segmented max: loop only over segments actually present in this tile
    # (typically 1-2 for sorted `batch`); one (TILE_N, H2p) where/max pass each,
    # maxed into a dynamically indexed row of the resident accumulator.
    bid = bid_ref[...]                                         # (TILE_N, 1)
    tile = pl.program_id(0) * pl.num_programs(1) + pl.program_id(1)
    seg_lo = seg_ref[tile, 0]
    seg_hi = seg_ref[tile, 1]

    def _seg_body(s, carry):
        row = jnp.max(jnp.where(bid == s, h, -jnp.inf), axis=0, keepdims=True)
        cur = out_ref[pl.ds(s, 1), :]
        out_ref[pl.ds(s, 1), :] = jnp.maximum(cur, row)
        return carry

    lax.fori_loop(seg_lo, seg_hi + 1, _seg_body, 0)


def global_sa_module(x, pos, batch, params, num_batches, *, tile_n=2048,
                     compute_dtype=None):
    """x: (N, C) f32, pos: (N, 3) f32, batch: (N,) int (example id per point,
    PyG-style; sorted batch gives the fastest epilogue but is not required).
    params = (w1 (C+3, H1), b1 (1, H1) or (H1,), w2 (H1, H2), b2 (1, H2) or (H2,)).
    Returns (out (B, H2) f32, pos_zeros (B, 3), batch_arange (B,))."""
    if compute_dtype is None:
        compute_dtype = _default_compute_dtype()

    w1, b1, w2, b2 = params
    n, c = x.shape
    p_dim = pos.shape[1]
    cin = c + p_dim
    h1 = w1.shape[1]
    h2 = w2.shape[1]

    h1p = _round_up(h1, _LANE)
    h2p = _round_up(h2, _LANE)
    b_pad = _round_up(max(num_batches, 1), _SUBLANE)
    cin_pad = _round_up(cin, _SUBLANE)          # 7 -> 8: one packed layer-1 stream

    if n < tile_n:                              # shrink for tiny inputs (single tile)
        tile_n = max(16, _round_up(n, 16))
    num_cores = _num_tensorcores()
    tiles_per_core = pl.cdiv(pl.cdiv(n, tile_n), num_cores)
    num_tiles = num_cores * tiles_per_core
    n_pad = num_tiles * tile_n

    # Pack [x | pos] into one stream; zero-pad rows (points) and feature columns.
    xp = jnp.concatenate([x.astype(jnp.float32), pos.astype(jnp.float32)], axis=1)
    xp = jnp.pad(xp, ((0, n_pad - n), (0, cin_pad - cin))).astype(compute_dtype)

    bid = jnp.pad(batch.astype(jnp.int32), (0, n_pad - n), constant_values=-1)

    # Per-tile segment bounds for SMEM scalar prefetch (empty tile -> [0, -1]).
    bid_tiles = bid.reshape(num_tiles, tile_n)
    seg_hi = jnp.max(bid_tiles, axis=1)
    seg_lo = jnp.min(jnp.where(bid_tiles < 0, jnp.int32(2 ** 30), bid_tiles), axis=1)
    seg_lo = jnp.where(seg_hi < 0, 0, seg_lo)
    seg_lo = jnp.clip(seg_lo, 0, b_pad - 1)
    seg_hi = jnp.clip(seg_hi, -1, b_pad - 1)
    seg_bounds = jnp.stack([seg_lo, seg_hi], axis=1).astype(jnp.int32)

    bid_col = bid[:, None]                      # (n_pad, 1) int32

    w1_p = jnp.pad(w1.astype(jnp.float32),
                   ((0, cin_pad - cin), (0, h1p - h1))).astype(compute_dtype)
    b1_p = jnp.pad(b1.astype(jnp.float32).reshape(1, -1), ((0, 0), (0, h1p - h1)))
    w2_p = jnp.pad(w2.astype(jnp.float32),
                   ((0, h1p - h1), (0, h2p - h2))).astype(compute_dtype)
    b2_p = jnp.pad(b2.astype(jnp.float32).reshape(1, -1), ((0, 0), (0, h2p - h2)))

    row_map = lambda cc, i, seg: (cc * tiles_per_core + i, 0)
    const_map = lambda cc, i, seg: (0, 0)

    itemsize = jnp.dtype(compute_dtype).itemsize
    cost = pl.CostEstimate(
        flops=2 * n_pad * (cin_pad * h1p + h1p * h2p),
        transcendentals=0,
        bytes_accessed=(n_pad * cin_pad * itemsize + n_pad * 4
                        + (cin_pad * h1p + h1p * h2p) * itemsize
                        + (h1p + h2p) * 4 + num_cores * b_pad * h2p * 4),
    )

    out = pl.pallas_call(
        _global_sa_kernel,
        out_shape=jax.ShapeDtypeStruct((num_cores, b_pad, h2p), jnp.float32),
        grid_spec=pltpu.PrefetchScalarGridSpec(
            num_scalar_prefetch=1,
            grid=(num_cores, tiles_per_core),
            in_specs=[
                pl.BlockSpec((tile_n, cin_pad), row_map),
                pl.BlockSpec((tile_n, 1), row_map),
                pl.BlockSpec((cin_pad, h1p), const_map),
                pl.BlockSpec((1, h1p), const_map),
                pl.BlockSpec((h1p, h2p), const_map),
                pl.BlockSpec((1, h2p), const_map),
            ],
            out_specs=pl.BlockSpec((None, b_pad, h2p), lambda cc, i, seg: (cc, 0, 0)),
        ),
        compiler_params=pltpu.CompilerParams(
            dimension_semantics=("parallel", "arbitrary"),
            vmem_limit_bytes=32 * 1024 * 1024,
        ),
        cost_estimate=cost,
    )(seg_bounds, xp, bid_col, w1_p, b1_p, w2_p, b2_p)

    out = jnp.max(out, axis=0)[:num_batches, :h2]  # combine per-core partials, strip pad
    pos_out = jnp.zeros((num_batches, 3), dtype=pos.dtype)
    batch_out = jnp.arange(num_batches, dtype=batch.dtype)
    return out, pos_out, batch_out


def _reference(x, pos, batch, params, num_batches):
    w1, b1, w2, b2 = params
    xp = jnp.concatenate([x, pos], axis=1)
    h = jnp.maximum(xp @ w1 + b1.reshape(1, -1), 0.0)
    h = jnp.maximum(h @ w2 + b2.reshape(1, -1), 0.0)
    mask = batch[None, :] == jnp.arange(num_batches)[:, None]
    he = jnp.where(mask[:, :, None], h[None, :, :], -jnp.inf)
    return jnp.max(he, axis=1)


if __name__ == "__main__":
    key = jax.random.PRNGKey(0)
    k1, k2, k3, k4, k5, k6, k7, k8 = jax.random.split(key, 8)

    # Shapes consistent with the module: B examples, P points each, C feature
    # channels + 3D positions, hidden sizes H1 -> H2.
    B, P, C = 2, 16, 4
    N = B * P
    CIN = C + 3
    H1, H2 = 32, 64

    x = jax.random.normal(k1, (N, C), dtype=jnp.float32)
    pos = jax.random.normal(k2, (N, 3), dtype=jnp.float32)
    batch = jnp.repeat(jnp.arange(B, dtype=jnp.int32), P)

    w1 = jax.random.normal(k3, (CIN, H1), dtype=jnp.float32) * 0.1
    b1 = jax.random.normal(k4, (1, H1), dtype=jnp.float32) * 0.01
    w2 = jax.random.normal(k5, (H1, H2), dtype=jnp.float32) * 0.1
    b2 = jax.random.normal(k6, (1, H2), dtype=jnp.float32) * 0.01
    params = (w1, b1, w2, b2)

    # 1) Strict f32 check, single-tile path.
    out, pos_out, batch_out = global_sa_module(x, pos, batch, params, B,
                                               compute_dtype=jnp.float32)
    out = jax.block_until_ready(out)
    jax.block_until_ready(pos_out)
    jax.block_until_ready(batch_out)
    ref = _reference(x, pos, batch, params, B)
    assert out.shape == (B, H2)
    assert pos_out.shape == (B, 3)
    assert batch_out.shape == (B,)
    assert jnp.allclose(out, ref, atol=1e-3, rtol=1e-3)

    # 2) Multi-tile reduction path: small tile_n forces several grid steps per
    #    accumulator block, multi-segment tiles, and point-row padding.
    B2, P2 = 4, 300
    N2 = B2 * P2
    x2 = jax.random.normal(k7, (N2, C), dtype=jnp.float32)
    pos2 = jax.random.normal(k8, (N2, 3), dtype=jnp.float32)
    batch2 = jnp.repeat(jnp.arange(B2, dtype=jnp.int32), P2)
    out2, _, _ = global_sa_module(x2, pos2, batch2, params, B2,
                                  tile_n=256, compute_dtype=jnp.float32)
    out2 = jax.block_until_ready(out2)
    ref2 = _reference(x2, pos2, batch2, params, B2)
    assert out2.shape == (B2, H2)
    assert jnp.allclose(out2, ref2, atol=1e-3, rtol=1e-3)

    # 3) Auto compute dtype (bf16 matmul operands on v6e/v7x, f32 elsewhere);
    #    tolerance loosened to cover bf16 operand quantization.
    out3, _, _ = global_sa_module(x2, pos2, batch2, params, B2)
    out3 = jax.block_until_ready(out3)
    assert out3.shape == (B2, H2)
    assert jnp.allclose(out3, ref2, atol=5e-2, rtol=5e-2)

    print("KERNEL_OK")
</pallas_src>

<mosaic_0001>
module attributes {stable_mosaic.version = 11 : i64} {
  func.func @_global_sa_kernel(%arg0: i32, %arg1: i32, %arg2: memref<1x2xi32, #tpu.memory_space<smem>>, %arg3: memref<32x8xf32, #tpu.memory_space<vmem>>, %arg4: memref<32x1xi32, #tpu.memory_space<vmem>>, %arg5: memref<8x128xf32, #tpu.memory_space<vmem>>, %arg6: memref<1x128xf32, #tpu.memory_space<vmem>>, %arg7: memref<128x128xf32, #tpu.memory_space<vmem>>, %arg8: memref<1x128xf32, #tpu.memory_space<vmem>>, %arg9: memref<1x8x128xf32, #tpu.memory_space<vmem>>) attributes {dimension_semantics = [#tpu.dimension_semantics<parallel>, #tpu.dimension_semantics<arbitrary>], iteration_bounds = array<i64: 1, 1>, scalar_prefetch = 1 : i64, scratch_operands = 0 : i64, tpu.core_type = #tpu.core_type<tc>, window_params = [{transform_indices = @transform_0, window_bounds = array<i64: 32, 8>}, {transform_indices = @transform_1, window_bounds = array<i64: 32, 1>}, {pipeline_mode = #tpu.pipeline_mode<synchronous>, transform_indices = @transform_2, window_bounds = array<i64: 8, 128>}, {pipeline_mode = #tpu.pipeline_mode<synchronous>, transform_indices = @transform_3, window_bounds = array<i64: 1, 128>}, {pipeline_mode = #tpu.pipeline_mode<synchronous>, transform_indices = @transform_4, window_bounds = array<i64: 128, 128>}, {pipeline_mode = #tpu.pipeline_mode<synchronous>, transform_indices = @transform_5, window_bounds = array<i64: 1, 128>}, {transform_indices = @transform_6, window_bounds = array<i64: 1, 8, 128>}]} {
    %c0_i32 = arith.constant 0 : i32
    %0 = arith.cmpi eq, %arg1, %c0_i32 : i32
    %1 = arith.extui %0 : i1 to i32
    %c0_i32_0 = arith.constant 0 : i32
    %2 = arith.cmpi ne, %1, %c0_i32_0 : i32
    scf.if %2 {
      %cst_19 = arith.constant 0xFF800000 : f32
      %28 = vector.broadcast %cst_19 : f32 to vector<8x128xf32>
      %c0_20 = arith.constant 0 : index
      %c0_21 = arith.constant 0 : index
      %c0_22 = arith.constant 0 : index
      %29 = vector.load %arg9[%c0_20, %c0_21, %c0_22] : memref<1x8x128xf32, #tpu.memory_space<vmem>>, vector<1x8x128xf32>
      %30 = vector.shape_cast %29 : vector<1x8x128xf32> to vector<8x128xf32>
      %31 = vector.shape_cast %28 : vector<8x128xf32> to vector<1x8x128xf32>
      tpu.vector_store %arg9[%c0_20, %c0_21, %c0_22], %31 {strides = array<i32>} : memref<1x8x128xf32, #tpu.memory_space<vmem>>, vector<1x8x128xf32>,
    } else {
    }
    %c0 = arith.constant 0 : index
    %c0_1 = arith.constant 0 : index
    %3 = vector.load %arg3[%c0, %c0_1] : memref<32x8xf32, #tpu.memory_space<vmem>>, vector<32x8xf32>
    %c0_2 = arith.constant 0 : index
    %c0_3 = arith.constant 0 : index
    %4 = vector.load %arg5[%c0_2, %c0_3] : memref<8x128xf32, #tpu.memory_space<vmem>>, vector<8x128xf32>
    %cst = arith.constant dense<0.000000e+00> : vector<32x128xf32>
    %5 = tpu.matmul %3, %4, %cst {dimension_numbers = #tpu.dot_dimension_numbers<[1], [0], [0], [1], [0, 0, 1, 1], [], []>} : vector<32x8xf32>, vector<8x128xf32>, vector<32x128xf32> -> vector<32x128xf32>
    %c0_4 = arith.constant 0 : index
    %c0_5 = arith.constant 0 : index
    %6 = vector.load %arg6[%c0_4, %c0_5] : memref<1x128xf32, #tpu.memory_space<vmem>>, vector<1x128xf32>
    %7 = vector.broadcast %6 : vector<1x128xf32> to vector<32x128xf32>
    %8 = arith.addf %5, %7 : vector<32x128xf32>
    %cst_6 = arith.constant 0.000000e+00 : f32
    %9 = vector.broadcast %cst_6 : f32 to vector<32x128xf32>
    %10 = arith.maximumf %8, %9 : vector<32x128xf32>
    %c0_7 = arith.constant 0 : index
    %c0_8 = arith.constant 0 : index
    %11 = vector.load %arg7[%c0_7, %c0_8] : memref<128x128xf32, #tpu.memory_space<vmem>>, vector<128x128xf32>
    %cst_9 = arith.constant dense<0.000000e+00> : vector<32x128xf32>
    %12 = tpu.matmul %10, %11, %cst_9 {dimension_numbers = #tpu.dot_dimension_numbers<[1], [0], [0], [1], [0, 0, 1, 1], [], []>} : vector<32x128xf32>, vector<128x128xf32>, vector<32x128xf32> -> vector<32x128xf32>
    %c0_10 = arith.constant 0 : index
    %c0_11 = arith.constant 0 : index
    %13 = vector.load %arg8[%c0_10, %c0_11] : memref<1x128xf32, #tpu.memory_space<vmem>>, vector<1x128xf32>
    %14 = vector.broadcast %13 : vector<1x128xf32> to vector<32x128xf32>
    %15 = arith.addf %12, %14 : vector<32x128xf32>
    %cst_12 = arith.constant 0.000000e+00 : f32
    %16 = vector.broadcast %cst_12 : f32 to vector<32x128xf32>
    %17 = arith.maximumf %15, %16 : vector<32x128xf32>
    %c0_13 = arith.constant 0 : index
    %c0_14 = arith.constant 0 : index
    %18 = vector.load %arg4[%c0_13, %c0_14] : memref<32x1xi32, #tpu.memory_space<vmem>>, vector<32x1xi32>
    %c1_i32 = arith.constant 1 : i32
    %19 = arith.muli %arg0, %c1_i32 : i32
    %20 = arith.addi %19, %arg1 : i32
    %21 = arith.index_cast %20 : i32 to index
    %c0_15 = arith.constant 0 : index
    %22 = memref.load %arg2[%21, %c0_15] : memref<1x2xi32, #tpu.memory_space<smem>>
    %23 = arith.index_cast %20 : i32 to index
    %c1 = arith.constant 1 : index
    %24 = memref.load %arg2[%23, %c1] : memref<1x2xi32, #tpu.memory_space<smem>>
    %c1_i32_16 = arith.constant 1 : i32
    %25 = arith.addi %24, %c1_i32_16 : i32
    %c0_i32_17 = arith.constant 0 : i32
    %26 = arith.subi %25, %22 : i32
    %27 = arith.addi %22, %26 : i32
    %c1_i32_18 = arith.constant 1 : i32
    scf.for %arg10 = %22 to %27 step %c1_i32_18  : i32 {
      %28 = vector.broadcast %arg10 : i32 to vector<32x1xi32>
      %29 = arith.cmpi eq, %18, %28 : vector<32x1xi32>
      %cst_19 = arith.constant 0xFF800000 : f32
      %30 = vector.shape_cast %29 : vector<32x1xi1> to vector<32x1xi1>
      %31 = vector.broadcast %30 : vector<32x1xi1> to vector<32x128xi1>
      %32 = vector.broadcast %cst_19 : f32 to vector<32x128xf32>
      %33 = arith.select %31, %17, %32 : vector<32x128xi1>, vector<32x128xf32>
      %cst_20 = arith.constant dense<0xFF800000> : vector<128xf32>
      %34 = vector.multi_reduction <maximumf>, %33, %cst_20 [0] : vector<32x128xf32> to vector<128xf32>
      %35 = vector.shape_cast %34 : vector<128xf32> to vector<1x128xf32>
      %c0_21 = arith.constant 0 : index
      %36 = arith.index_cast %arg10 : i32 to index
      %c0_22 = arith.constant 0 : index
      %37 = vector.load %arg9[%c0_21, %36, %c0_22] : memref<1x8x128xf32, #tpu.memory_space<vmem>>, vector<1x1x128xf32>
      %38 = vector.shape_cast %37 : vector<1x1x128xf32> to vector<1x128xf32>
      %39 = arith.maximumf %38, %35 : vector<1x128xf32>
      %c0_23 = arith.constant 0 : index
      %40 = arith.index_cast %arg10 : i32 to index
      %c0_24 = arith.constant 0 : index
      %41 = vector.load %arg9[%c0_23, %40, %c0_24] : memref<1x8x128xf32, #tpu.memory_space<vmem>>, vector<1x1x128xf32>
      %42 = vector.shape_cast %41 : vector<1x1x128xf32> to vector<1x128xf32>
      %43 = vector.shape_cast %39 : vector<1x128xf32> to vector<1x1x128xf32>
      tpu.vector_store %arg9[%c0_23, %40, %c0_24], %43 {strides = array<i32>} : memref<1x8x128xf32, #tpu.memory_space<vmem>>, vector<1x1x128xf32>,
    }
    return
  }
  func.func @transform_0(%arg0: i32, %arg1: i32, %arg2: memref<1x2xi32, #tpu.memory_space<smem>>) -> (i32, i32) {
    %c1_i32 = arith.constant 1 : i32
    %0 = arith.muli %arg0, %c1_i32 : i32
    %1 = arith.addi %0, %arg1 : i32
    %c0_i32 = arith.constant 0 : i32
    %c0_i32_0 = arith.constant 0 : i32
    return %1, %c0_i32 : i32, i32
  }
  func.func @transform_1(%arg0: i32, %arg1: i32, %arg2: memref<1x2xi32, #tpu.memory_space<smem>>) -> (i32, i32) {
    %c1_i32 = arith.constant 1 : i32
    %0 = arith.muli %arg0, %c1_i32 : i32
    %1 = arith.addi %0, %arg1 : i32
    %c0_i32 = arith.constant 0 : i32
    %c0_i32_0 = arith.constant 0 : i32
    return %1, %c0_i32 : i32, i32
  }
  func.func @transform_2(%arg0: i32, %arg1: i32, %arg2: memref<1x2xi32, #tpu.memory_space<smem>>) -> (i32, i32) {
    %c0_i32 = arith.constant 0 : i32
    %c0_i32_0 = arith.constant 0 : i32
    %c0_i32_1 = arith.constant 0 : i32
    return %c0_i32, %c0_i32_0 : i32, i32
  }
  func.func @transform_3(%arg0: i32, %arg1: i32, %arg2: memref<1x2xi32, #tpu.memory_space<smem>>) -> (i32, i32) {
    %c0_i32 = arith.constant 0 : i32
    %c0_i32_0 = arith.constant 0 : i32
    %c0_i32_1 = arith.constant 0 : i32
    return %c0_i32, %c0_i32_0 : i32, i32
  }
  func.func @transform_4(%arg0: i32, %arg1: i32, %arg2: memref<1x2xi32, #tpu.memory_space<smem>>) -> (i32, i32) {
    %c0_i32 = arith.constant 0 : i32
    %c0_i32_0 = arith.constant 0 : i32
    %c0_i32_1 = arith.constant 0 : i32
    return %c0_i32, %c0_i32_0 : i32, i32
  }
  func.func @transform_5(%arg0: i32, %arg1: i32, %arg2: memref<1x2xi32, #tpu.memory_space<smem>>) -> (i32, i32) {
    %c0_i32 = arith.constant 0 : i32
    %c0_i32_0 = arith.constant 0 : i32
    %c0_i32_1 = arith.constant 0 : i32
    return %c0_i32, %c0_i32_0 : i32, i32
  }
  func.func @transform_6(%arg0: i32, %arg1: i32, %arg2: memref<1x2xi32, #tpu.memory_space<smem>>) -> (i32, i32, i32) {
    %c0_i32 = arith.constant 0 : i32
    %c0_i32_0 = arith.constant 0 : i32
    %c0_i32_1 = arith.constant 0 : i32
    return %arg0, %c0_i32, %c0_i32_0 : i32, i32, i32
  }
}

</mosaic_0001>

<bundles_post_ra>
// kernel: tpu_custom_call.1
= control target key start
LH: loop header
LB: loop body
LE: loop exit
PB: predicated region body
PF: predicated region fallthrough
CT: control target
= control target key end

     0   :  { %s730_s0 = inlined_call_operand.vmem [shape: s32[1,2], index: 0, kind: input, shape index: {}]   ;;  %s731_s1 = inlined_call_operand.vmem [shape: f32[32,8], index: 1, kind: input, shape index: {}]   ;;  %s732_s2 = inlined_call_operand.vmem [shape: s32[32,1], index: 2, kind: input, shape index: {}]   ;;  %s733_s3 = inlined_call_operand.vmem [shape: f32[8,128], index: 3, kind: input, shape index: {}]   ;;  %s734_s4 = inlined_call_operand.vmem [shape: f32[1,128], index: 4, kind: input, shape index: {}]   ;;  %s735_s5 = inlined_call_operand.hbm [shape: f32[128,128], index: 5, kind: input, shape index: {}]   ;;  %s736_s6 = inlined_call_operand.vmem [shape: f32[1,128], index: 6, kind: input, shape index: {}]   ;;  %s737_s7 = inlined_call_operand.hbm [shape: f32[1,8,128], index: 7, kind: output, shape index: {}]  }
   0x1   :  { %s12_s26 = sshll.u32 %s730_s0, 4  ;;  %s13_s26 = int_to_ptr.vmem [resolvable:$true] %s12_s26 }
   0x2   :  { %s538_s27 = scalar_lea.vmem %s13_s26, 16  ;;  %p543_p1 = scmp.lt.s32.totalorder %s13_s26, %s13_s26 }
   0x3   :  { %p539_p0 = scmp.ne.s32.totalorder %s13_s26, %s538_s27  ;;  %p544_p2 = scmp.lt.s32.totalorder %s538_s27, %s538_s27 }
   0x5   :  { %p545_p3 = por %p544_p2, %p543_p1 }
   0x7   :  { %p546_p4 = pnand %p545_p3, %p539_p0 }
   0x9   :  { %549 = shalt.err (!%p546_p4)  }
   0xa   :  { %s604_s28 = smov [#allocation3]  }
   0xb   :  { %15 = dma.vmem_to_smem %s13_s26, 16, %s604_s28, [#allocation2] }
   0xc   :  { %594 = dma.done.wait [#allocation2], 16 }
   0xd   :  { %595 = vsyncadd [#allocation2], 4294967280 }
   0xe   :  { %17 = sfence }
   0xf   :  { %18 = vsyncpa [#allocation5], 0 }
  0x10   :  { %19 = vsyncpa [#allocation6], 0  ;;  %s605_s29 = smov [#allocation4]  }
  0x11   :  { %s49_s30 = sshll.u32 %s605_s29, 4  ;;  %s50_s30 = int_to_ptr.vmem [resolvable:$true] %s49_s30 }
  0x12   :  { %s558_s8 = scalar_lea.vmem %s50_s30, 2048  ;;  %p563_p6 = scmp.lt.s32.totalorder %s50_s30, %s50_s30 }
  0x13   :  { %p559_p5 = scmp.ne.s32.totalorder %s50_s30, %s558_s8  ;;  %p564_p7 = scmp.lt.s32.totalorder %s558_s8, %s558_s8 }
  0x15   :  { %p565_p8 = por %p564_p7, %p563_p6 }
  0x17   :  { %p566_p9 = pnand %p565_p8, %p559_p5 }
  0x19   :  { %569 = shalt.err (!%p566_p9)
}
  0x1a   :  { %s606_s0 = smov 128   ;;  %s607_s9 = smov 8  }
  0x1b   :  { %55 = dma.hbm_to_vmem [thread:$0]  %s735_s5, 2048, %s50_s30, [#allocation5], %s606_s0, %s606_s0, %s607_s9  }
  0x1c   :  { %596 = dma.done.wait [#allocation5], 2048  }
  0x1d   :  { %597 = vsyncadd [#allocation5], 4294965248  ;;  %v608_v0 = vmov -inf   ;;  %s657_s12 = sld [smem:[#allocation3]]   ;;  %vm106_vm0 = vcmask 64512   ;;  %v664_v1 = vld [vmem:[%s732_s2] sm:$0xff] }
  0x1e   :  { %93 = vst [vmem:[#allocation7] sm:$0xff] %v608_v0  ;;  %s659_s13 = sld [smem:[#allocation3 + $0x1]]  ;;  %v669_v2 = vld [vmem:[%s732_s2 + $0x8] sm:$0xff]  ;;  %v674_v3 = vld [vmem:[%s732_s2 + $0x10] sm:$0xff]  ;;  %v679_v4 = vld [vmem:[%s732_s2 + $0x18] sm:$0xff] }
  0x1f   :  { %v98_v5 = vld [vmem:[%s733_s3] sm:$0xff]  ;;  %v95_v7 = vld [vmem:[%s731_s1 + $0x8] sm:$0xff]  ;;  %v96_v8 = vld [vmem:[%s731_s1 + $0x10] sm:$0xff] }
  0x20   :  { %v94_v6 = vld [vmem:[%s731_s1] sm:$0xff]  ;;  %443 = vmatprep.subr.mxu0 %v98_v5  ;;  %v223_v9 = vld [vmem:[#allocation4 + $0x78] sm:$0xff]  ;;  %v222_v10 = vld [vmem:[#allocation4 + $0x70] sm:$0xff] }
  0x21   :  { %445 = vmatprep.mubr.msk.f32.mxu0 %vm106_vm0, %v94_v6  ;;  %444 = vmatpush3.msra.mxu0 %v98_v5  ;;  %v97_v11 = vld [vmem:[%s731_s1 + $0x18] sm:$0xff]  ;;  %v221_v12 = vld [vmem:[#allocation4 + $0x68] sm:$0xff]  ;;  %v220_v13 = vld [vmem:[#allocation4 + $0x60] sm:$0xff] }
  0x22   :  { %446 = vmatmul.mubr.msk.f32.vlgmr.msra.gmra.mxu0 %vm106_vm0, %v95_v7  ;;  %451 = vmatprep.subr.mxu0 %v223_v9  ;;  %v219_v14 = vld [vmem:[#allocation4 + $0x58] sm:$0xff]  ;;  %v218_v15 = vld [vmem:[#allocation4 + $0x50] sm:$0xff]  ;;  %v217_v16 = vld [vmem:[#allocation4 + $0x48] sm:$0xff] }
  0x23   :  { %448 = vmatprep.mubr.msk.f32.mxu0 %vm106_vm0, %v96_v8  ;;  %452 = vmatpush3.msra.mxu0 %v223_v9  ;;  %v216_v17 = vld [vmem:[#allocation4 + $0x40] sm:$0xff]  ;;  %v215_v18 = vld [vmem:[#allocation4 + $0x38] sm:$0xff]  ;;  %v214_v19 = vld [vmem:[#allocation4 + $0x30] sm:$0xff] }
  0x24   :  { %s329_s21 = sadd.s32 1, %s659_s13  ;;  %453 = vmatprep.subr.mxu0 %v222_v10  ;;  %489 = vmatprep.subr.mxu1 %v223_v9  ;;  %v213_v20 = vld [vmem:[#allocation4 + $0x28] sm:$0xff]  ;;  %v212_v21 = vld [vmem:[#allocation4 + $0x20] sm:$0xff]  ;;  %v211_v22 = vld [vmem:[#allocation4 + $0x18] sm:$0xff] }
  0x25   :  { %454 = vmatpush3.msra.mxu0 %v222_v10  ;;  %505 = vmatpush3.msra.mxu1 %v223_v9  ;;  %v210_v23 = vld [vmem:[#allocation4 + $0x10] sm:$0xff]  ;;  %v209_v24 = vld [vmem:[#allocation4 + $0x8] sm:$0xff]  ;;  %v208_v25 = vld [vmem:[#allocation4] sm:$0xff]  ;;  %p407_p10 = scmp.ge.s32.totalorder %s657_s12, %s329_s21 }
  0x26   :  { %449 = vmatmul.mubr.msk.f32.gmra.mxu0 %vm106_vm0, %v97_v11  ;;  %455 = vmatprep.subr.mxu0 %v221_v12  ;;  %v411_v26 = vld [vmem:[%s734_s4] ss:$0 sm:$0xff] }
  0x27   :  { %456 = vmatpush3.msra.mxu0 %v221_v12  ;;  %490 = vmatprep.subr.mxu1 %v222_v10  ;;  %v416_v39 = vld [vmem:[%s736_s6] ss:$0 sm:$0xff] }
  0x28   :  { %457 = vmatprep.subr.mxu0 %v220_v13  ;;  %506 = vmatpush3.msra.mxu1 %v222_v10 }
  0x29   :  { %458 = vmatpush3.msra.mxu0 %v220_v13  ;;  %491 = vmatprep.subr.mxu1 %v221_v12 }
  0x2a   :  { %459 = vmatprep.subr.mxu0 %v219_v14  ;;  %507 = vmatpush3.msra.mxu1 %v221_v12 }
  0x2b   :  { %460 = vmatpush3.msra.mxu0 %v219_v14  ;;  %492 = vmatprep.subr.mxu1 %v220_v13 }
  0x2c   :  { %461 = vmatprep.subr.mxu0 %v218_v15  ;;  %508 = vmatpush3.msra.mxu1 %v220_v13 }
  0x2d   :  { %462 = vmatpush3.msra.mxu0 %v218_v15  ;;  %493 = vmatprep.subr.mxu1 %v219_v14 }
  0x2e   :  { %463 = vmatprep.subr.mxu0 %v217_v16  ;;  %509 = vmatpush3.msra.mxu1 %v219_v14 }
  0x2f   :  { %464 = vmatpush3.msra.mxu0 %v217_v16  ;;  %494 = vmatprep.subr.mxu1 %v218_v15 }
  0x30   :  { %465 = vmatprep.subr.mxu0 %v216_v17  ;;  %510 = vmatpush3.msra.mxu1 %v218_v15 }
  0x31   :  { %466 = vmatpush3.msra.mxu0 %v216_v17  ;;  %495 = vmatprep.subr.mxu1 %v217_v16 }
  0x32   :  { %467 = vmatprep.subr.mxu0 %v215_v18  ;;  %511 = vmatpush3.msra.mxu1 %v217_v16 }
  0x33   :  { %468 = vmatpush3.msra.mxu0 %v215_v18  ;;  %496 = vmatprep.subr.mxu1 %v216_v17 }
  0x34   :  { %469 = vmatprep.subr.mxu0 %v214_v19  ;;  %512 = vmatpush3.msra.mxu1 %v216_v17 }
  0x35   :  { %470 = vmatpush3.msra.mxu0 %v214_v19  ;;  %497 = vmatprep.subr.mxu1 %v215_v18 }
  0x36   :  { %471 = vmatprep.subr.mxu0 %v213_v20  ;;  %513 = vmatpush3.msra.mxu1 %v215_v18 }
  0x37   :  { %472 = vmatpush3.msra.mxu0 %v213_v20  ;;  %498 = vmatprep.subr.mxu1 %v214_v19 }
  0x38   :  { %473 = vmatprep.subr.mxu0 %v212_v21  ;;  %514 = vmatpush3.msra.mxu1 %v214_v19 }
  0x39   :  { %474 = vmatpush3.msra.mxu0 %v212_v21  ;;  %499 = vmatprep.subr.mxu1 %v213_v20 }
  0x3a   :  { %515 = vmatpush3.msra.mxu1 %v213_v20  ;;  %475 = vmatprep.subr.mxu0 %v211_v22 }
  0x3b   :  { %500 = vmatprep.subr.mxu1 %v212_v21  ;;  %476 = vmatpush3.msra.mxu0 %v211_v22 }
  0x3c   :  { %516 = vmatpush3.msra.mxu1 %v212_v21  ;;  %477 = vmatprep.subr.mxu0 %v210_v23 }
  0x3d   :  { %501 = vmatprep.subr.mxu1 %v211_v22  ;;  %478 = vmatpush3.msra.mxu0 %v210_v23 }
  0x3e   :  { %517 = vmatpush3.msra.mxu1 %v211_v22  ;;  %479 = vmatprep.subr.mxu0 %v209_v24 }
  0x3f   :  { %502 = vmatprep.subr.mxu1 %v210_v23  ;;  %480 = vmatpush3.msra.mxu0 %v209_v24 }
  0x40   :  { %518 = vmatpush3.msra.mxu1 %v210_v23  ;;  %481 = vmatprep.subr.mxu0 %v208_v25 }
  0x41   :  { %503 = vmatprep.subr.mxu1 %v209_v24  ;;  %482 = vmatpush3.msra.mxu0 %v208_v25 }
  0x42   :  { %519 = vmatpush3.msra.mxu1 %v209_v24 }
  0x43   :  { %504 = vmatprep.subr.mxu1 %v208_v25 }
  0x44   :  { %520 = vmatpush3.msra.mxu1 %v208_v25 }
  0xe2   :  { %v447_v27 = vpop.f32.mrf.mxu0 }
  0xe3   :  { %v191_v28 = vadd.f32 %v447_v27, %v411_v26 }
  0xe4   :  { %v185_v29 = vpop.f32.mrf.mxu0 }
  0xe5   :  { %v186_v30 = vadd.f32 %v411_v26, %v185_v29  ;;  %v205_v33 = vmax.f32 %v191_v28, 0.0 }
  0xe6   :  { %v450_v31 = vpop.f32.mrf.mxu0 }
  0xe7   :  { %v204_v32 = vmax.f32 %v186_v30, 0.0  ;;  %v201_v34 = vadd.f32 %v450_v31, %v411_v26 }
  0xe8   :  { %v195_v35 = vpop.f32.mrf.mxu0 }
  0xe9   :  { %483 = vmatprep.mubr.f32.mxu0 %v204_v32  ;;  %v196_v36 = vadd.f32 %v411_v26, %v195_v35  ;;  %v207_v38 = vmax.f32 %v201_v34, 0.0 }
  0xea   :  { %484 = vmatmul.mubr.f32.vlgmr.msra.gmra.mxu0 %v205_v33 }
  0xeb   :  { %v206_v37 = vmax.f32 %v196_v36, 0.0 }
  0xed   :  { %486 = vmatprep.mubr.f32.mxu1 %v206_v37 }
  0xee   :  { %487 = vmatmul.mubr.f32.vlgmr.msra.gmra.mxu1 %v207_v38 }
 0x1aa   :  { %v485_v40 = vpop.f32.mrf.mxu0 }
 0x1ab   :  { %v303_v41 = vadd.f32 %v485_v40, %v416_v39 }
 0x1ac   :  { %v297_v42 = vpop.f32.mrf.mxu0 }
 0x1ad   :  { %v317_v43 = vmax.f32 %v303_v41, 0.0  ;;  %v298_v44 = vadd.f32 %v416_v39, %v297_v42 }
 0x1ae   :  { %v488_v45 = vpop.f32.mrf.mxu1 }
 0x1af   :  { %v316_v46 = vmax.f32 %v298_v44, 0.0  ;;  %v313_v47 = vadd.f32 %v488_v45, %v416_v39  ;;  %408 = sbr.rel (%p407_p10) target bundleno = 588 (0x24c), region = 60 }
 0x1b0   :  { %v307_v48 = vpop.f32.mrf.mxu1 }
 0x1b1   :  { %v319_v49 = vmax.f32 %v313_v47, 0.0  ;;  %v308_v50 = vadd.f32 %v416_v39, %v307_v48 }
 0x1b3   :  { %v318_v51 = vmax.f32 %v308_v50, 0.0 }
 0x1b4 LB: > { %v609_v52 = vmov 0   ;;  %v336_v53 = vstv %s602_s12  ;;  %s374_s4 = scalar_lea.vmem [#allocation7], %s602_s12  ;;  %s333_s12 = sadd.s32 1, %s602_s12   ;;  %s602_s12 = sphi %s657_s12, %s333_s12  }
 0x1b5   : > { %537 = vset.pattern.permute.xlu1 %v609_v52  ;;  %536 = vset.pattern.permute.xlu0 %v609_v52  ;;  %vm339_vm1 = vcmp.eq.s32.totalorder %v674_v3, %v336_v53  ;;  %vm337_vm2 = vcmp.eq.s32.totalorder %v664_v1, %v336_v53  ;;  %vm340_vm3 = vcmp.eq.s32.totalorder %v679_v4, %v336_v53  ;;  %v375_v14 = vld [vmem:[%s374_s4] sm:$0x1]  ;;  %p332_p11 = scmp.ge.s32.totalorder %s333_s12, %s329_s21 }
 0x1b6   : > { %vm338_vm4 = vcmp.eq.s32.totalorder %v669_v2, %v336_v53  ;;  %v343_v54 = vsel %vm339_vm1, 1, %v609_v52  ;;  %v341_v55 = vsel %vm337_vm2, 1, %v609_v52  ;;  %v344_v56 = vsel %vm340_vm3, 1, %v609_v52 }
 0x1b7   : > { %352 = vperm.xlu1 %537, %v343_v54   ;;  %346 = vperm.xlu0 %536, %v341_v55   ;;  %v342_v57 = vsel %vm338_vm4, 1, %v609_v52 }
 0x1bb   : > { %355 = vperm.xlu1 %537, %v344_v56   ;;  %349 = vperm.xlu0 %536, %v342_v57  }
 0x232   : > { %v353_v58 = vpop.permute.xlu1 %352  ;;  %v347_v59 = vpop.permute.xlu0 %346 }
 0x233   : > { %vm359_vm5 = vcmp.eq.s32.totalorder %v353_v58, 1  ;;  %vm357_vm6 = vcmp.eq.s32.totalorder %v347_v59, 1 }
 0x234   : > { %v363_v62 = vsel %vm359_vm5, %v318_v51, -inf  ;;  %v361_v63 = vsel %vm357_vm6, %v316_v46, -inf }
 0x236   : > { %v356_v60 = vpop.permute.xlu1 %355  ;;  %v350_v61 = vpop.permute.xlu0 %349 }
 0x237   : > { %vm360_vm7 = vcmp.eq.s32.totalorder %v356_v60, 1  ;;  %vm358_vm8 = vcmp.eq.s32.totalorder %v350_v61, 1 }
 0x238   : > { %v364_v0 = vsel %vm360_vm7, %v319_v49, -inf  ;;  %v362_v5 = vsel %vm358_vm8, %v317_v43, -inf }
 0x239   : > { %v366_v6 = vmax.f32 %v363_v62, %v364_v0  ;;  %v365_v7 = vmax.f32 %v361_v63, %v362_v5 }
 0x23b   : > { %v367_v8 = vmax.f32 %v365_v7, %v366_v6 }
 0x23d   : > { %v368_v9 = vrot.slane %v367_v8, 4 }
 0x23f   : > { %v369_v10 = vmax.f32 %v367_v8, %v368_v9 }
 0x241   : > { %v370_v11 = vrot.slane %v369_v10, 2 }
 0x243   : > { %v371_v12 = vmax.f32 %v369_v10, %v370_v11 }
 0x245   : > { %v372_v13 = vrot.slane %v371_v12, 1 }
 0x247   : > { %v373_v15 = vmax.f32 %v371_v12, %v372_v13  ;;  %335 = sbr.rel (!%p332_p11) target bundleno = 436 (0x1b4), region = 66 }
 0x249   : > { %v376_v16 = vmax.f32 %v375_v14, %v373_v15 }
 0x24b   : > { %377 = vst [vmem:[%s374_s4] sm:$0x1] %v376_v16 }
 0x24c PF:  { %s610_s6 = smov [#allocation7]  }
 0x24d   :  { %s384_s9 = sshll.u32 %s610_s6, 4  ;;  %s385_s9 = int_to_ptr.vmem [resolvable:$true] %s384_s9 }
 0x24e   :  { %s570_s10 = scalar_lea.vmem %s385_s9, 128  ;;  %p575_p13 = scmp.lt.s32.totalorder %s385_s9, %s385_s9 }
 0x24f   :  { %p571_p12 = scmp.ne.s32.totalorder %s385_s9, %s570_s10  ;;  %p576_p0 = scmp.lt.s32.totalorder %s570_s10, %s570_s10 }
 0x251   :  { %p577_p1 = por %p576_p0, %p575_p13 }
 0x253   :  { %p578_p2 = pnand %p577_p1, %p571_p12 }
 0x255   :  { %581 = shalt.err (!%p578_p2)
}
 0x256   :  { %387 = dma.vmem_to_hbm [thread:$0]  %s385_s9, 128, %s737_s7, [#allocation6]  }
 0x257   :  { %598 = dma.done.wait [#allocation6], 128  }
 0x258   :  { %599 = vsyncadd [#allocation6], 4294967168 }
 0x259   :  { %391 = vsyncpa [#allocation5], 1 }
 0x25a   :  { %392 = vsyncpa [#allocation6], 1 }

</bundles_post_ra>
